<compile_context>
chip_gen: v7x
topology: tpu7x:2x2x1
jax: 0.10.0
libtpu: 0.0.40
codegen_flags: <defaults>
</compile_context>

<pallas_src>
import math
import functools

import jax
import jax.numpy as jnp
from jax import lax
from jax.experimental import pallas as pl
from jax.experimental.pallas import tpu as pltpu


# ----------------------------------------------------------------------------
# Shared math helpers (usable both inside kernels and in the wrapper)
# ----------------------------------------------------------------------------
def _softplus(x):
    # Stable log(1 + exp(x)): never overflows for large rho.
    return jnp.maximum(x, 0.0) + jnp.log(1.0 + jnp.exp(-jnp.abs(x)))


def _log_normal(x, mu, sigma_sq):
    return -0.5 * (jnp.log(2.0 * math.pi * sigma_sq) + (x - mu) ** 2 / sigma_sq)


def _log_mixture_prior(x, sigma_1, sigma_2, pi):
    # logsumexp form of log(pi*N(x;0,s1^2) + (1-pi)*N(x;0,s2^2)): no underflow.
    lp1 = _log_normal(x, 0.0, sigma_1 ** 2) + math.log(pi)
    lp2 = _log_normal(x, 0.0, sigma_2 ** 2) + math.log(1.0 - pi)
    m = jnp.maximum(lp1, lp2)
    return m + jnp.log(jnp.exp(lp1 - m) + jnp.exp(lp2 - m))


# ----------------------------------------------------------------------------
# Kernel 1: fused Bayesian-linear forward.
# Grid = (out_tiles, batch_tiles); weight blocks depend only on the outer axis.
# ----------------------------------------------------------------------------
def _fwd_kernel(x_ref, wmu_ref, wrho_ref, weps_ref, b_ref, out_ref, w_scratch):
    # Sample this out-tile's weights once (inner batch step 0) and keep them
    # resident in VMEM as bf16 for every batch tile.
    @pl.when(pl.program_id(1) == 0)
    def _():
        w_sigma = _softplus(wrho_ref[...])                     # f32, EUP/VPU
        w = wmu_ref[...] + weps_ref[...] * w_sigma             # f32 reparam
        w_scratch[...] = w.astype(jnp.bfloat16)

    # x[b, k] . w[o, k] -> out[b, o]  (PyTorch [out, in] layout, no transpose)
    acc = lax.dot_general(
        x_ref[...], w_scratch[...],
        dimension_numbers=(((1,), (1,)), ((), ())),
        preferred_element_type=jnp.float32)
    out_ref[...] = (acc + b_ref[...]).astype(out_ref.dtype)


# ----------------------------------------------------------------------------
# Kernel 2: KL divergence (posterior sample vs scale-mixture prior),
# tiled over weight-row blocks with an accumulator; padding is masked out.
# ----------------------------------------------------------------------------
def _kl_kernel(wmu_ref, wrho_ref, weps_ref, bmu_ref, brho_ref, beps_ref,
               kl_ref, acc_ref, *, n_out, n_in, row_tile,
               prior_sigma_1, prior_sigma_2, prior_pi):
    i = pl.program_id(0)

    @pl.when(i == 0)
    def _():
        acc_ref[...] = jnp.zeros_like(acc_ref)

    w_mu, w_rho, w_eps = wmu_ref[...], wrho_ref[...], weps_ref[...]
    w_sigma = _softplus(w_rho)
    w = w_mu + w_eps * w_sigma
    contrib = (_log_normal(w, w_mu, w_sigma * w_sigma)
               - _log_mixture_prior(w, prior_sigma_1, prior_sigma_2, prior_pi))
    rows = i * row_tile + lax.broadcasted_iota(jnp.int32, contrib.shape, 0)
    cols = lax.broadcasted_iota(jnp.int32, contrib.shape, 1)
    contrib = jnp.where((rows < n_out) & (cols < n_in), contrib, 0.0)
    acc_ref[...] += jnp.sum(jnp.sum(contrib, axis=-1, keepdims=True),
                            axis=0, keepdims=True)

    @pl.when(i == pl.num_programs(0) - 1)
    def _():
        b_mu, b_rho, b_eps = bmu_ref[...], brho_ref[...], beps_ref[...]
        b_sigma = _softplus(b_rho)
        b = b_mu + b_eps * b_sigma
        bc = (_log_normal(b, b_mu, b_sigma * b_sigma)
              - _log_mixture_prior(b, prior_sigma_1, prior_sigma_2, prior_pi))
        bcols = lax.broadcasted_iota(jnp.int32, bc.shape, 1)
        bc = jnp.where(bcols < n_out, bc, 0.0)
        kl_ref[...] = acc_ref[...] + jnp.sum(
            jnp.sum(bc, axis=-1, keepdims=True), axis=0, keepdims=True)


# ----------------------------------------------------------------------------
# Wrapper
# ----------------------------------------------------------------------------
def _round_up(n, m):
    return -(-n // m) * m


def _maybe_pad2d(a, rows, cols):
    if a.shape == (rows, cols):
        return a                         # skip the HBM copy when already aligned
    return jnp.pad(a, ((0, rows - a.shape[0]), (0, cols - a.shape[1])))


def sample_epsilon(key, w_shape, b_shape):
    """JAX equivalent of torch.randn_like for the weight/bias noise."""
    kw, kb = jax.random.split(key)
    return (jax.random.normal(kw, w_shape, jnp.float32),
            jax.random.normal(kb, b_shape, jnp.float32))


def bayesian_linear(x, w_mu, w_rho, b_mu, b_rho, key, *,
                    return_kl=False,
                    prior_sigma_1=1.0, prior_sigma_2=0.1, prior_pi=0.5,
                    block_b=256, block_n=256):
    """Pallas forward of BayesianLinear.

    x     : [B, in_features]               f32
    w_mu  : [out_features, in_features]    (PyTorch layout, kept as-is)
    w_rho : [out_features, in_features]
    b_mu  : [out_features]
    b_rho : [out_features]
    key   : PRNG key for the reparameterisation noise.
    """
    B, K = x.shape
    O, K2 = w_mu.shape
    assert K2 == K and b_mu.shape == (O,) and b_rho.shape == (O,)

    w_eps, b_eps = sample_epsilon(key, (O, K), (O,))

    # Tile sizes: batch tiles (sublane aligned), out tiles (lane aligned).
    tb = min(block_b, _round_up(B, 8))
    tn = min(block_n, _round_up(O, 128))
    B_pad = _round_up(B, tb)
    O_pad = _round_up(O, tn)
    K_pad = _round_up(K, 128)

    # Pad only when needed; x is fed as bf16 (MXU-native, half the DMA bytes).
    x_p = _maybe_pad2d(x, B_pad, K_pad).astype(jnp.bfloat16)
    w_mu_p = _maybe_pad2d(w_mu, O_pad, K_pad)
    w_rho_p = _maybe_pad2d(w_rho, O_pad, K_pad)
    w_eps_p = _maybe_pad2d(w_eps, O_pad, K_pad)

    # Bias sampled with plain XLA (only O elements); single f32 row.
    bias_row = (b_mu + b_eps * _softplus(b_rho)).reshape(1, O)
    bias_p = _maybe_pad2d(bias_row, 1, O_pad)

    grid = (O_pad // tn, B_pad // tb)          # out OUTER, batch INNER
    x_spec = pl.BlockSpec((tb, K_pad), lambda j, i: (i, 0))
    w_spec = pl.BlockSpec((tn, K_pad), lambda j, i: (j, 0))   # resident across i
    b_spec = pl.BlockSpec((1, tn), lambda j, i: (0, j))
    o_spec = pl.BlockSpec((tb, tn), lambda j, i: (i, j))

    # VMEM: double-buffered blocks + the bf16 sampled-weight scratch.
    est = (2 * (tb * K_pad * 2 + 3 * tn * K_pad * 4 + tn * 4 + tb * tn * 4)
           + tn * K_pad * 2)
    vmem_limit = int(min(max(est + (4 << 20), 32 << 20), 64 << 20))

    out_p = pl.pallas_call(
        _fwd_kernel,
        out_shape=jax.ShapeDtypeStruct((B_pad, O_pad), jnp.float32),
        grid=grid,
        in_specs=[x_spec, w_spec, w_spec, w_spec, b_spec],
        out_specs=o_spec,
        scratch_shapes=[pltpu.VMEM((tn, K_pad), jnp.bfloat16)],
        compiler_params=pltpu.CompilerParams(
            dimension_semantics=("parallel", "arbitrary"),
            vmem_limit_bytes=vmem_limit),
    )(x_p, w_mu_p, w_rho_p, w_eps_p, bias_p)

    output = out_p[:B, :O]
    if not return_kl:
        return output

    # --- KL: tiled reduction over weight-row blocks; padded elements masked. ---
    b_mu_p = _maybe_pad2d(b_mu.reshape(1, O), 1, O_pad)
    b_rho_p = _maybe_pad2d(b_rho.reshape(1, O), 1, O_pad)
    b_eps_p = _maybe_pad2d(b_eps.reshape(1, O), 1, O_pad)

    row_tile = tn
    kl_grid = (O_pad // row_tile,)
    wk_spec = pl.BlockSpec((row_tile, K_pad), lambda i: (i, 0))
    bk_spec = pl.BlockSpec((1, O_pad), lambda i: (0, 0))

    est_kl = 2 * (3 * row_tile * K_pad * 4 + 3 * O_pad * 4 + 4) + 4
    vmem_limit_kl = int(min(max(est_kl + (4 << 20), 32 << 20), 64 << 20))

    kl = pl.pallas_call(
        functools.partial(_kl_kernel, n_out=O, n_in=K, row_tile=row_tile,
                          prior_sigma_1=prior_sigma_1,
                          prior_sigma_2=prior_sigma_2,
                          prior_pi=prior_pi),
        out_shape=jax.ShapeDtypeStruct((1, 1), jnp.float32),
        grid=kl_grid,
        in_specs=[wk_spec, wk_spec, wk_spec, bk_spec, bk_spec, bk_spec],
        out_specs=pl.BlockSpec((1, 1), lambda i: (0, 0)),
        scratch_shapes=[pltpu.VMEM((1, 1), jnp.float32)],
        compiler_params=pltpu.CompilerParams(
            dimension_semantics=("arbitrary",),
            vmem_limit_bytes=vmem_limit_kl),
    )(w_mu_p, w_rho_p, w_eps_p, b_mu_p, b_rho_p, b_eps_p)[0, 0]

    return output, kl


# ----------------------------------------------------------------------------
# Pure-JAX reference (module math, f32) for the sanity check
# ----------------------------------------------------------------------------
def reference(x, w_mu, w_rho, b_mu, b_rho, w_eps, b_eps,
              prior_sigma_1=1.0, prior_sigma_2=0.1, prior_pi=0.5):
    w_sigma = jnp.log(1.0 + jnp.exp(w_rho))
    b_sigma = jnp.log(1.0 + jnp.exp(b_rho))
    w = w_mu + w_eps * w_sigma
    b = b_mu + b_eps * b_sigma
    out = x @ w.T + b

    def log_normal(v, mu, s2):
        return -0.5 * (jnp.log(2.0 * math.pi * s2) + (v - mu) ** 2 / s2)

    def log_prior(v):
        lp1 = log_normal(v, 0.0, prior_sigma_1 ** 2)
        lp2 = log_normal(v, 0.0, prior_sigma_2 ** 2)
        return jnp.log(prior_pi * jnp.exp(lp1) + (1.0 - prior_pi) * jnp.exp(lp2))

    kl = (jnp.sum(log_normal(w, w_mu, w_sigma ** 2) - log_prior(w))
          + jnp.sum(log_normal(b, b_mu, b_sigma ** 2) - log_prior(b)))
    return out, kl


if __name__ == "__main__":
    # Small, deliberately non-128-aligned shapes; the wrapper pads internally.
    B, IN, OUT = 16, 32, 24

    key = jax.random.PRNGKey(0)
    k_x, k_wmu, k_wrho, k_bmu, k_brho, k_eps = jax.random.split(key, 6)

    x = jax.random.normal(k_x, (B, IN), jnp.float32)
    # Parameter init mirrors the PyTorch module:
    #   mu ~ N(posterior_mu_init=0.0, 0.1), rho ~ N(posterior_rho_init=-3.0, 0.1)
    w_mu = 0.0 + 0.1 * jax.random.normal(k_wmu, (OUT, IN), jnp.float32)
    w_rho = -3.0 + 0.1 * jax.random.normal(k_wrho, (OUT, IN), jnp.float32)
    b_mu = 0.0 + 0.1 * jax.random.normal(k_bmu, (OUT,), jnp.float32)
    b_rho = -3.0 + 0.1 * jax.random.normal(k_brho, (OUT,), jnp.float32)

    out, kl = bayesian_linear(x, w_mu, w_rho, b_mu, b_rho, k_eps, return_kl=True)
    out, kl = jax.block_until_ready((out, kl))

    # Reference with the identical epsilon draw.
    w_eps, b_eps = sample_epsilon(k_eps, (OUT, IN), (OUT,))
    ref_out, ref_kl = reference(x, w_mu, w_rho, b_mu, b_rho, w_eps, b_eps)

    assert out.shape == (B, OUT)
    # bf16 MXU operands -> loosened tolerance vs the f32 reference.
    assert jnp.allclose(out, ref_out, rtol=2e-2, atol=2e-2), "output mismatch"
    assert jnp.allclose(kl, ref_kl, rtol=1e-3, atol=1e-2), "KL mismatch"

    print("KERNEL_OK")
</pallas_src>

<mosaic_0001>
module attributes {stable_mosaic.version = 11 : i64} {
  func.func @_fwd_kernel(%arg0: i32, %arg1: i32, %arg2: memref<16x128xbf16, #tpu.memory_space<vmem>>, %arg3: memref<128x128xf32, #tpu.memory_space<vmem>>, %arg4: memref<128x128xf32, #tpu.memory_space<vmem>>, %arg5: memref<128x128xf32, #tpu.memory_space<vmem>>, %arg6: memref<1x128xf32, #tpu.memory_space<vmem>>, %arg7: memref<16x128xf32, #tpu.memory_space<vmem>>, %arg8: memref<128x128xbf16, #tpu.memory_space<vmem>>) attributes {dimension_semantics = [#tpu.dimension_semantics<parallel>, #tpu.dimension_semantics<arbitrary>], iteration_bounds = array<i64: 1, 1>, scalar_prefetch = 0 : i64, scratch_operands = 1 : i64, tpu.core_type = #tpu.core_type<tc>, window_params = [{transform_indices = @transform_0, window_bounds = array<i64: 16, 128>}, {transform_indices = @transform_1, window_bounds = array<i64: 128, 128>}, {transform_indices = @transform_2, window_bounds = array<i64: 128, 128>}, {transform_indices = @transform_3, window_bounds = array<i64: 128, 128>}, {transform_indices = @transform_4, window_bounds = array<i64: 1, 128>}, {transform_indices = @transform_5, window_bounds = array<i64: 16, 128>}]} {
    %c0_i32 = arith.constant 0 : i32
    %0 = arith.cmpi eq, %arg1, %c0_i32 : i32
    %1 = arith.extui %0 : i1 to i32
    %c0_i32_0 = arith.constant 0 : i32
    %2 = arith.cmpi ne, %1, %c0_i32_0 : i32
    scf.if %2 {
      %c0_8 = arith.constant 0 : index
      %c0_9 = arith.constant 0 : index
      %10 = vector.load %arg4[%c0_8, %c0_9] : memref<128x128xf32, #tpu.memory_space<vmem>>, vector<128x128xf32>
      %cst_10 = arith.constant 0.000000e+00 : f32
      %11 = vector.broadcast %cst_10 : f32 to vector<128x128xf32>
      %12 = arith.maximumf %10, %11 : vector<128x128xf32>
      %13 = math.absf %10 : vector<128x128xf32>
      %cst_11 = arith.constant 0.000000e+00 : f32
      %14 = vector.broadcast %cst_11 : f32 to vector<128x128xf32>
      %15 = arith.subf %14, %13 : vector<128x128xf32>
      %16 = math.exp %15 : vector<128x128xf32>
      %cst_12 = arith.constant 1.000000e+00 : f32
      %17 = vector.broadcast %cst_12 : f32 to vector<128x128xf32>
      %18 = arith.addf %17, %16 : vector<128x128xf32>
      %19 = math.log %18 : vector<128x128xf32>
      %20 = arith.addf %12, %19 : vector<128x128xf32>
      %c0_13 = arith.constant 0 : index
      %c0_14 = arith.constant 0 : index
      %21 = vector.load %arg3[%c0_13, %c0_14] : memref<128x128xf32, #tpu.memory_space<vmem>>, vector<128x128xf32>
      %c0_15 = arith.constant 0 : index
      %c0_16 = arith.constant 0 : index
      %22 = vector.load %arg5[%c0_15, %c0_16] : memref<128x128xf32, #tpu.memory_space<vmem>>, vector<128x128xf32>
      %23 = arith.mulf %22, %20 : vector<128x128xf32>
      %24 = arith.addf %21, %23 : vector<128x128xf32>
      %25 = arith.truncf %24 : vector<128x128xf32> to vector<128x128xbf16>
      %c0_17 = arith.constant 0 : index
      %c0_18 = arith.constant 0 : index
      %26 = vector.load %arg8[%c0_17, %c0_18] : memref<128x128xbf16, #tpu.memory_space<vmem>>, vector<128x128xbf16>
      tpu.vector_store %arg8[%c0_17, %c0_18], %25 {strides = array<i32>} : memref<128x128xbf16, #tpu.memory_space<vmem>>, vector<128x128xbf16>,
    } else {
    }
    %c0 = arith.constant 0 : index
    %c0_1 = arith.constant 0 : index
    %3 = vector.load %arg2[%c0, %c0_1] : memref<16x128xbf16, #tpu.memory_space<vmem>>, vector<16x128xbf16>
    %c0_2 = arith.constant 0 : index
    %c0_3 = arith.constant 0 : index
    %4 = vector.load %arg8[%c0_2, %c0_3] : memref<128x128xbf16, #tpu.memory_space<vmem>>, vector<128x128xbf16>
    %cst = arith.constant dense<0.000000e+00> : vector<16x128xf32>
    %5 = tpu.matmul %3, %4, %cst {dimension_numbers = #tpu.dot_dimension_numbers<[1], [1], [0], [0], [0, 0, 1, 0], [], []>} : vector<16x128xbf16>, vector<128x128xbf16>, vector<16x128xf32> -> vector<16x128xf32>
    %c0_4 = arith.constant 0 : index
    %c0_5 = arith.constant 0 : index
    %6 = vector.load %arg6[%c0_4, %c0_5] : memref<1x128xf32, #tpu.memory_space<vmem>>, vector<1x128xf32>
    %7 = vector.broadcast %6 : vector<1x128xf32> to vector<16x128xf32>
    %8 = arith.addf %5, %7 : vector<16x128xf32>
    %c0_6 = arith.constant 0 : index
    %c0_7 = arith.constant 0 : index
    %9 = vector.load %arg7[%c0_6, %c0_7] : memref<16x128xf32, #tpu.memory_space<vmem>>, vector<16x128xf32>
    tpu.vector_store %arg7[%c0_6, %c0_7], %8 {strides = array<i32>} : memref<16x128xf32, #tpu.memory_space<vmem>>, vector<16x128xf32>,
    return
  }
  func.func @transform_0(%arg0: i32, %arg1: i32) -> (i32, i32) {
    %c0_i32 = arith.constant 0 : i32
    %c0_i32_0 = arith.constant 0 : i32
    return %arg1, %c0_i32 : i32, i32
  }
  func.func @transform_1(%arg0: i32, %arg1: i32) -> (i32, i32) {
    %c0_i32 = arith.constant 0 : i32
    %c0_i32_0 = arith.constant 0 : i32
    return %arg0, %c0_i32 : i32, i32
  }
  func.func @transform_2(%arg0: i32, %arg1: i32) -> (i32, i32) {
    %c0_i32 = arith.constant 0 : i32
    %c0_i32_0 = arith.constant 0 : i32
    return %arg0, %c0_i32 : i32, i32
  }
  func.func @transform_3(%arg0: i32, %arg1: i32) -> (i32, i32) {
    %c0_i32 = arith.constant 0 : i32
    %c0_i32_0 = arith.constant 0 : i32
    return %arg0, %c0_i32 : i32, i32
  }
  func.func @transform_4(%arg0: i32, %arg1: i32) -> (i32, i32) {
    %c0_i32 = arith.constant 0 : i32
    %c0_i32_0 = arith.constant 0 : i32
    return %c0_i32, %arg0 : i32, i32
  }
  func.func @transform_5(%arg0: i32, %arg1: i32) -> (i32, i32) {
    %c0_i32 = arith.constant 0 : i32
    return %arg1, %arg0 : i32, i32
  }
}

</mosaic_0001>

<bundles_post_ra>
// kernel: tpu_custom_call.1
= control target key start
LH: loop header
LB: loop body
LE: loop exit
PB: predicated region body
PF: predicated region fallthrough
CT: control target
= control target key end

     0   :  { %10 = vsyncpa [#allocation4], 0  ;;  %s827_s0 = inlined_call_operand.hbm [shape: bf16[16,128], index: 0, kind: input, shape index: {}]   ;;  %s828_s1 = inlined_call_operand.hbm [shape: f32[128,128], index: 1, kind: input, shape index: {}]   ;;  %s829_s2 = inlined_call_operand.hbm [shape: f32[128,128], index: 2, kind: input, shape index: {}]   ;;  %s830_s3 = inlined_call_operand.hbm [shape: f32[128,128], index: 3, kind: input, shape index: {}]   ;;  %s831_s4 = inlined_call_operand.vmem [shape: f32[1,128], index: 4, kind: input, shape index: {}]   ;;  %s832_s5 = inlined_call_operand.hbm [shape: f32[16,128], index: 5, kind: output, shape index: {}]  }
   0x1   :  { %11 = vsyncpa [#allocation7], 0 }
   0x2   :  { %12 = vsyncpa [#allocation10], 0 }
   0x3   :  { %13 = vsyncpa [#allocation5], 0  ;;  %s631_s18 = smov [#allocation6]   ;;  %s513_s22 = scalar_lea.hbm %s828_s1, 2048 }
   0x4   :  { %s31_s19 = sshll.u32 %s631_s18, 4  ;;  %p514_p0 = scmp.ne.s32.totalorder %s828_s1, %s513_s22  ;;  %s32_s19 = int_to_ptr.vmem [resolvable:$true] %s31_s19 }
   0x5   :  { %p517_p1 = scmp.lt.u32.totalorder %s513_s22, %s828_s1 }
   0x7   :  { %p519_p2 = pnand %p517_p1, %p514_p0 }
   0x9   :  { %522 = shalt.err (!%p519_p2)
}
   0xa   :  { %s523_s27 = scalar_lea.vmem %s32_s19, 2048  ;;  %p528_p4 = scmp.lt.s32.totalorder %s32_s19, %s32_s19 }
   0xb   :  { %p524_p3 = scmp.ne.s32.totalorder %s32_s19, %s523_s27  ;;  %p529_p5 = scmp.lt.s32.totalorder %s523_s27, %s523_s27 }
   0xd   :  { %p530_p6 = por %p529_p5, %p528_p4 }
   0xf   :  { %p531_p7 = pnand %p530_p6, %p524_p3 }
  0x11   :  { %534 = shalt.err (!%p531_p7)
}
  0x12   :  { %s632_s28 = smov 128   ;;  %s633_s29 = smov 8  }
  0x13   :  { %37 = dma.hbm_to_vmem [thread:$0]  %s828_s1, 2048, %s32_s19, [#allocation7], %s632_s28, %s632_s28, %s633_s29  }
  0x14   :  { %s634_s7 = smov [#allocation3]   ;;  %s535_s11 = scalar_lea.hbm %s827_s0, 128 }
  0x15   :  { %s19_s8 = sshll.u32 %s634_s7, 4  ;;  %p536_p8 = scmp.ne.s32.totalorder %s827_s0, %s535_s11  ;;  %s20_s8 = int_to_ptr.vmem [resolvable:$true] %s19_s8 }
  0x16   :  { %p539_p9 = scmp.lt.u32.totalorder %s535_s11, %s827_s0 }
  0x18   :  { %p541_p10 = pnand %p539_p9, %p536_p8 }
  0x1a   :  { %544 = shalt.err (!%p541_p10)
}
  0x1b   :  { %s545_s16 = scalar_lea.vmem %s20_s8, 128  ;;  %p550_p12 = scmp.lt.s32.totalorder %s20_s8, %s20_s8 }
  0x1c   :  { %p546_p11 = scmp.ne.s32.totalorder %s20_s8, %s545_s16  ;;  %p551_p13 = scmp.lt.s32.totalorder %s545_s16, %s545_s16 }
  0x1e   :  { %p552_p0 = por %p551_p13, %p550_p12 }
  0x20   :  { %p553_p1 = pnand %p552_p0, %p546_p11 }
  0x22   :  { %556 = shalt.err (!%p553_p1)
}
  0x23   :  { %s635_s1 = smov 64   ;;  %s636_s17 = smov 4  }
  0x24   :  { %25 = dma.hbm_to_vmem [thread:$0]  %s827_s0, 128, %s20_s8, [#allocation4], %s635_s1, %s635_s1, %s636_s17  }
  0x25   :  { %s637_s20 = smov [#allocation8]   ;;  %s638_s22 = smov [#allocation9]  }
  0x26   :  { %s43_s21 = sshll.u32 %s637_s20, 4  ;;  %s55_s23 = sshll.u32 %s638_s22, 4  ;;  %s44_s21 = int_to_ptr.vmem [resolvable:$true] %s43_s21  ;;  %s699_s23 = int_to_ptr.vmem [resolvable:$true] %s55_s23 }
  0x27   :  { %s557_s26 = scalar_lea.hbm %s829_s2, 2048 }
  0x28   :  { %p558_p2 = scmp.ne.s32.totalorder %s829_s2, %s557_s26  ;;  %p561_p3 = scmp.lt.u32.totalorder %s557_s26, %s829_s2 }
  0x2a   :  { %p563_p4 = pnand %p561_p3, %p558_p2 }
  0x2c   :  { %566 = shalt.err (!%p563_p4)
}
  0x2d   :  { %s567_s0 = scalar_lea.vmem %s44_s21, 2048  ;;  %p572_p6 = scmp.lt.s32.totalorder %s44_s21, %s44_s21 }
  0x2e   :  { %p568_p5 = scmp.ne.s32.totalorder %s44_s21, %s567_s0  ;;  %p573_p7 = scmp.lt.s32.totalorder %s567_s0, %s567_s0 }
  0x30   :  { %p574_p8 = por %p573_p7, %p572_p6 }
  0x32   :  { %p575_p9 = pnand %p574_p8, %p568_p5 }
  0x34   :  { %578 = shalt.err (!%p575_p9)
}
  0x35   :  { %49 = dma.hbm_to_vmem [thread:$0]  %s829_s2, 2048, %s44_s21, [#allocation7], %s632_s28, %s632_s28, %s633_s29  }
  0x36   :  { %s579_s12 = scalar_lea.hbm %s830_s3, 2048 }
  0x37   :  { %p580_p10 = scmp.ne.s32.totalorder %s830_s3, %s579_s12  ;;  %p583_p11 = scmp.lt.u32.totalorder %s579_s12, %s830_s3 }
  0x39   :  { %p585_p12 = pnand %p583_p11, %p580_p10 }
  0x3b   :  { %588 = shalt.err (!%p585_p12)
}
  0x3c   :  { %s589_s1 = scalar_lea.vmem %s699_s23, 2048  ;;  %p594_p0 = scmp.lt.s32.totalorder %s699_s23, %s699_s23 }
  0x3d   :  { %p590_p13 = scmp.ne.s32.totalorder %s699_s23, %s589_s1  ;;  %p595_p1 = scmp.lt.s32.totalorder %s589_s1, %s589_s1 }
  0x3f   :  { %p596_p2 = por %p595_p1, %p594_p0 }
  0x41   :  { %p597_p3 = pnand %p596_p2, %p590_p13 }
  0x43   :  { %600 = shalt.err (!%p597_p3)
}
  0x44   :  { %61 = dma.hbm_to_vmem [thread:$0]  %s830_s3, 2048, %s699_s23, [#allocation10], %s632_s28, %s632_s28, %s633_s29  }
  0x45   :  { %623 = dma.done.wait [#allocation4], 128  }
  0x46   :  { %624 = vsyncadd [#allocation4], 4294967168 }
  0x47   :  { %625 = dma.done.wait [#allocation7], 4096  }
  0x48   :  { %626 = vsyncadd [#allocation7], 4294963200 }
  0x49   :  { %627 = dma.done.wait [#allocation10], 2048  }
  0x4a   :  { %628 = vsyncadd [#allocation10], 4294965248  ;;  %v639_v0 = vmov 0.0   ;;  %vm640_vm0 = vmmov 0   ;;  %v738_v1 = vld [vmem:[#allocation8] sm:$0xff]  ;;  %v740_v2 = vld [vmem:[#allocation8 + $0x8] sm:$0xff] }
  0x4b   :  { %417 = vmatprep.subr.bf16.mxu0 %v639_v0  ;;  %433 = vmatprep.mubr.msk.bf16.mxu0 %vm640_vm0, %v639_v0  ;;  %v113_v3 = vand.u32 2147483647, %v738_v1  ;;  %v114_v4 = vand.u32 2147483647, %v740_v2  ;;  %v744_v7 = vld [vmem:[#allocation8 + $0x10] sm:$0xff]  ;;  %v746_v8 = vld [vmem:[#allocation8 + $0x18] sm:$0xff] }
  0x4c   :  { %v115_v9 = vand.u32 2147483647, %v744_v7  ;;  %v116_v10 = vand.u32 2147483647, %v746_v8  ;;  %v750_v15 = vld [vmem:[#allocation8 + $0x20] sm:$0xff]  ;;  %v752_v16 = vld [vmem:[#allocation8 + $0x28] sm:$0xff] }
  0x4d   :  { %v129_v5 = vsub.f32 0.0, %v113_v3  ;;  %v130_v6 = vsub.f32 0.0, %v114_v4  ;;  %v117_v17 = vand.u32 2147483647, %v750_v15  ;;  %v118_v20 = vand.u32 2147483647, %v752_v16 }
  0x4e   :  { %v131_v13 = vsub.f32 0.0, %v115_v9  ;;  %v132_v14 = vsub.f32 0.0, %v116_v10  ;;  %v756_v22 = vld [vmem:[#allocation8 + $0x30] sm:$0xff]  ;;  %v758_v24 = vld [vmem:[#allocation8 + $0x38] sm:$0xff]  ;;  %v762_v30 = vld [vmem:[#allocation8 + $0x40] sm:$0xff]  ;;  %v97_v10 = vmax.f32 %v738_v1, 0.0 }
  0x4f   :  { %v145_v11 = vmul.f32 1.442695, %v129_v5  ;;  %v147_v12 = vmul.f32 1.442695, %v130_v6  ;;  %v133_v21 = vsub.f32 0.0, %v117_v17  ;;  %v134_v23 = vsub.f32 0.0, %v118_v20 }
  0x50   :  { %v149_v18 = vmul.f32 1.442695, %v131_v13  ;;  %v151_v19 = vmul.f32 1.442695, %v132_v14  ;;  %v119_v25 = vand.u32 2147483647, %v756_v22 }
  0x51   :  { %449 = vpow2.f32 %v145_v11  ;;  %v153_v26 = vmul.f32 1.442695, %v133_v21  ;;  %v120_v27 = vand.u32 2147483647, %v758_v24  ;;  %v155_v28 = vmul.f32 1.442695, %v134_v23 }
  0x52   :  { %451 = vpow2.f32 %v147_v12  ;;  %v135_v29 = vsub.f32 0.0, %v119_v25  ;;  %v764_v32 = vld [vmem:[#allocation8 + $0x48] sm:$0xff]  ;;  %v121_v33 = vand.u32 2147483647, %v762_v30  ;;  %v768_v38 = vld [vmem:[#allocation8 + $0x50] sm:$0xff]  ;;  %v770_v40 = vld [vmem:[#allocation8 + $0x58] sm:$0xff] }
  0x53   :  { %453 = vpow2.f32 %v149_v18  ;;  %v136_v31 = vsub.f32 0.0, %v120_v27  ;;  %v122_v35 = vand.u32 2147483647, %v764_v32  ;;  %v123_v46 = vand.u32 2147483647, %v768_v38  ;;  %v774_v54 = vld [vmem:[#allocation8 + $0x60] sm:$0xff] }
  0x54   :  { %455 = vpow2.f32 %v151_v19  ;;  %v157_v34 = vmul.f32 1.442695, %v135_v29  ;;  %v137_v37 = vsub.f32 0.0, %v121_v33  ;;  %v124_v48 = vand.u32 2147483647, %v770_v40  ;;  %v776_v60 = vld [vmem:[#allocation8 + $0x68] sm:$0xff] }
  0x55   :  { %457 = vpow2.f32 %v153_v26  ;;  %v159_v36 = vmul.f32 1.442695, %v136_v31  ;;  %v138_v39 = vsub.f32 0.0, %v122_v35  ;;  %v139_v53 = vsub.f32 0.0, %v123_v46  ;;  %v781_v13 = vld [vmem:[#allocation8 + $0x70] sm:$0xff]  ;;  %v257_v20 = vld [vmem:[#allocation9] sm:$0xff] }
  0x56   :  { %459 = vpow2.f32 %v155_v28  ;;  %v161_v42 = vmul.f32 1.442695, %v137_v37  ;;  %v140_v56 = vsub.f32 0.0, %v124_v48  ;;  %v125_v61 = vand.u32 2147483647, %v774_v54  ;;  %v785_v27 = vld [vmem:[#allocation8 + $0x78] sm:$0xff] }
  0x57   :  { %461 = vpow2.f32 %v157_v34  ;;  %v163_v45 = vmul.f32 1.442695, %v138_v39  ;;  %v165_v63 = vmul.f32 1.442695, %v139_v53  ;;  %v126_v6 = vand.u32 2147483647, %v776_v60 }
  0x58   :  { %463 = vpow2.f32 %v159_v36  ;;  %v167_v4 = vmul.f32 1.442695, %v140_v56  ;;  %v141_v12 = vsub.f32 0.0, %v125_v61  ;;  %v98_v17 = vmax.f32 %v740_v2, 0.0  ;;  %v258_v31 = vld [vmem:[#allocation9 + $0x8] sm:$0xff]  ;;  %v241_v36 = vld [vmem:[#allocation6] sm:$0xff] }
  0x59   :  { %465 = vpow2.f32 %v161_v42  ;;  %v99_v21 = vmax.f32 %v744_v7, 0.0  ;;  %v142_v26 = vsub.f32 0.0, %v126_v6  ;;  %v127_v1 = vand.u32 2147483647, %v781_v13  ;;  %v242_v7 = vld [vmem:[#allocation6 + $0x8] sm:$0xff]  ;;  %v244_v61 = vld [vmem:[#allocation6 + $0x18] sm:$0xff] }
  0x5a   :  { %v100_v2 = vmax.f32 %v746_v8, 0.0  ;;  %v169_v33 = vmul.f32 1.442695, %v141_v12  ;;  %v101_v39 = vmax.f32 %v750_v15, 0.0  ;;  %v128_v46 = vand.u32 2147483647, %v785_v27 }
  0x5b   :  { %v450_v41 = vpop.eup %449  ;;  %s641_s19 = smov [#allocation11]  }
  0x5c   :  { %v452_v43 = vpop.eup %451  ;;  %v177_v44 = vadd.f32 1.0, %v450_v41  ;;  %v102_v41 = vmax.f32 %v752_v16, 0.0  ;;  %s392_s20 = sshll.u32 %s641_s19, 4  ;;  %s393_s20 = int_to_ptr.vmem [resolvable:$true] %s392_s20 }
  0x5d   :  { %v178_v47 = vadd.f32 1.0, %v452_v43  ;;  %v454_v49 = vpop.eup %453  ;;  %s601_s21 = scalar_lea.vmem %s393_s20, 256  ;;  %p606_p5 = scmp.lt.s32.totalorder %s393_s20, %s393_s20 }
  0x5e   :  { %467 = vlog2.f32 %v177_v44  ;;  %v456_v50 = vpop.eup %455  ;;  %v179_v51 = vadd.f32 1.0, %v454_v49  ;;  %v259_v44 = vld [vmem:[#allocation9 + $0x10] sm:$0xff]  ;;  %v260_v49 = vld [vmem:[#allocation9 + $0x18] sm:$0xff]  ;;  %p602_p4 = scmp.ne.s32.totalorder %s393_s20, %s601_s21  ;;  %p607_p6 = scmp.lt.s32.totalorder %s601_s21, %s601_s21 }
  0x5f   :  { %469 = vlog2.f32 %v178_v47  ;;  %v180_v52 = vadd.f32 1.0, %v456_v50  ;;  %v458_v55 = vpop.eup %457  ;;  %v171_v50 = vmul.f32 1.442695, %v142_v26 }
  0x60   :  { %471 = vpow2.f32 %v163_v45  ;;  %v460_v57 = vpop.eup %459  ;;  %v181_v58 = vadd.f32 1.0, %v458_v55  ;;  %p608_p7 = por %p607_p6, %p606_p5 }
  0x61   :  { %473 = vlog2.f32 %v179_v51  ;;  %v182_v59 = vadd.f32 1.0, %v460_v57  ;;  %v462_v62 = vpop.eup %461  ;;  %v143_v51 = vsub.f32 0.0, %v127_v1 }
  0x62   :  { %475 = vlog2.f32 %v180_v52  ;;  %v464_v3 = vpop.eup %463  ;;  %v183_v5 = vadd.f32 1.0, %v462_v62  ;;  %p609_p8 = pnand %p608_p7, %p602_p4 }
  0x63   :  { %477 = vlog2.f32 %v181_v58  ;;  %v466_v9 = vpop.eup %465  ;;  %v184_v11 = vadd.f32 1.0, %v464_v3  ;;  %v173_v6 = vmul.f32 1.442695, %v143_v51 }
  0x64   :  { %479 = vlog2.f32 %v182_v59  ;;  %v185_v45 = vadd.f32 1.0, %v466_v9  ;;  %v243_v59 = vld [vmem:[#allocation6 + $0x10] sm:$0xff] }
  0x65   :  { %481 = vpow2.f32 %v165_v63  ;;  %v144_v63 = vsub.f32 0.0, %v128_v46  ;;  %v106_v46 = vmax.f32 %v764_v32, 0.0  ;;  %v265_v32 = vld [vmem:[#allocation9 + $0x40] sm:$0xff] }
  0x66   :  { %483 = vpow2.f32 %v167_v4 }
  0x67   :  { %485 = vlog2.f32 %v183_v5 }
  0x68   :  { %v468_v14 = vpop.eup %467  ;;  %487 = vlog2.f32 %v184_v11 }
  0x69   :  { %v470_v18 = vpop.eup %469  ;;  %v194_v19 = vmul.f32 0.6931472, %v468_v14  ;;  %489 = vpow2.f32 %v169_v33 }
  0x6a   :  { %v472_v23 = vpop.eup %471  ;;  %v196_v25 = vmul.f32 0.6931472, %v470_v18  ;;  %491 = vlog2.f32 %v185_v45  ;;  %v261_v18 = vld [vmem:[#allocation9 + $0x20] sm:$0xff]  ;;  %v105_v45 = vmax.f32 %v762_v30, 0.0 }
  0x6b   :  { %v474_v28 = vpop.eup %473  ;;  %v225_v29 = vadd.f32 %v194_v19, %v97_v10  ;;  %v186_v56 = vadd.f32 1.0, %v472_v23  ;;  %493 = vpow2.f32 %v171_v50  ;;  %v262_v19 = vld [vmem:[#allocation9 + $0x28] sm:$0xff] }
  0x6c   :  { %v476_v34 = vpop.eup %475  ;;  %v226_v35 = vadd.f32 %v196_v25, %v98_v17  ;;  %v198_v37 = vmul.f32 0.6931472, %v474_v28  ;;  %v104_v25 = vmax.f32 %v758_v24, 0.0 }
  0x6d   :  { %v273_v42 = vmul.f32 %v257_v20, %v225_v29  ;;  %v200_v43 = vmul.f32 0.6931472, %v476_v34  ;;  %v478_v47 = vpop.eup %477  ;;  %495 = vlog2.f32 %v186_v56  ;;  %v175_v20 = vmul.f32 1.442695, %v144_v63  ;;  %v245_v34 = vld [vmem:[#allocation6 + $0x20] sm:$0xff] }
  0x6e   :  { %v274_v48 = vmul.f32 %v258_v31, %v226_v35  ;;  %v227_v8 = vadd.f32 %v198_v37, %v99_v21  ;;  %v480_v52 = vpop.eup %479  ;;  %v202_v16 = vmul.f32 0.6931472, %v478_v47  ;;  %v103_v21 = vmax.f32 %v756_v22, 0.0  ;;  %v246_v35 = vld [vmem:[#allocation6 + $0x28] sm:$0xff] }
  0x6f   :  { %v289_v53 = vadd.f32 %v273_v42, %v241_v36  ;;  %v228_v55 = vadd.f32 %v200_v43, %v100_v2  ;;  %v204_v58 = vmul.f32 0.6931472, %v480_v52  ;;  %v482_v3 = vpop.eup %481  ;;  %497 = vpow2.f32 %v173_v6  ;;  %v263_v42 = vld [vmem:[#allocation9 + $0x30] sm:$0xff]  ;;  %v264_v43 = vld [vmem:[#allocation9 + $0x38] sm:$0xff] }
  0x70   :  { %v290_v15 = vadd.f32 %v274_v48, %v242_v7  ;;  %v275_v57 = vmul.f32 %v259_v44, %v227_v8  ;;  %v484_v5 = vpop.eup %483  ;;  %v229_v12 = vadd.f32 %v202_v16, %v101_v39  ;;  %v187_v23 = vadd.f32 1.0, %v482_v3 }
  0x71   :  { %v276_v62 = vmul.f32 %v260_v49, %v228_v55  ;;  %v486_v9 = vpop.eup %485  ;;  %v230_v14 = vadd.f32 %v204_v58, %v102_v41  ;;  %v188_v1 = vadd.f32 1.0, %v484_v5  ;;  %499 = vpow2.f32 %v175_v20  ;;  %v248_v55 = vld [vmem:[#allocation6 + $0x38] sm:$0xff] }
  0x72   :  { %v305_v4 = vpack.c.bf16 %v290_v15, %v289_v53  ;;  %v291_v10 = vadd.f32 %v275_v57, %v243_v59  ;;  %v488_v17 = vpop.eup %487  ;;  %v206_v26 = vmul.f32 0.6931472, %v486_v9  ;;  %v277_v29 = vmul.f32 %v261_v18, %v229_v12  ;;  %v247_v53 = vld [vmem:[#allocation6 + $0x30] sm:$0xff]  ;;  %v249_v12 = vld [vmem:[#allocation6 + $0x40] sm:$0xff] }
  0x73   :  { %v292_v11 = vadd.f32 %v276_v62, %v244_v61  ;;  %v278_v31 = vmul.f32 %v262_v19, %v230_v14  ;;  %v208_v2 = vmul.f32 0.6931472, %v488_v17  ;;  %v490_v33 = vpop.eup %489  ;;  %501 = vlog2.f32 %v187_v23  ;;  %v266_v61 = vld [vmem:[#allocation9 + $0x48] sm:$0xff]  ;;  %v267_v23 = vld [vmem:[#allocation9 + $0x50] sm:$0xff] }
  0x74   :  { %418 = vmatpush3.bf16.xpose.msra.mxu0 %v305_v4  ;;  %v492_v36 = vpop.eup %491  ;;  %503 = vlog2.f32 %v188_v1  ;;  %v293_v22 = vadd.f32 %v277_v29, %v245_v34  ;;  %v231_v39 = vadd.f32 %v206_v26, %v103_v21  ;;  %v189_v44 = vadd.f32 1.0, %v490_v33  ;;  %v250_v14 = vld [vmem:[#allocation6 + $0x48] sm:$0xff]  ;;  %v251_v33 = vld [vmem:[#allocation6 + $0x50] sm:$0xff]  ;;  %v252_v34 = vld [vmem:[#allocation6 + $0x58] sm:$0xff] }
  0x75   :  { %419 = vmatprep.subr.bf16.mxu0 %v639_v0  ;;  %v306_v28 = vpack.c.bf16 %v292_v11, %v291_v10  ;;  %v494_v7 = vpop.eup %493  ;;  %v294_v37 = vadd.f32 %v278_v31, %v246_v35  ;;  %v232_v24 = vadd.f32 %v208_v2, %v104_v25  ;;  %v210_v47 = vmul.f32 0.6931472, %v492_v36 }
  0x76   :  { %v190_v48 = vadd.f32 1.0, %v494_v7  ;;  %v279_v49 = vmul.f32 %v263_v42, %v231_v39  ;;  %505 = vlog2.f32 %v189_v44  ;;  %v107_v63 = vmax.f32 %v768_v38, 0.0 }
  0x77   :  { %v496_v41 = vpop.eup %495  ;;  %v307_v8 = vpack.c.bf16 %v294_v37, %v293_v22  ;;  %v280_v50 = vmul.f32 %v264_v43, %v232_v24  ;;  %v233_v58 = vadd.f32 %v210_v47, %v105_v45  ;;  %v108_v3 = vmax.f32 %v770_v40, 0.0  ;;  %v268_v40 = vld [vmem:[#allocation9 + $0x58] sm:$0xff]  ;;  %v269_v24 = vld [vmem:[#allocation9 + $0x60] sm:$0xff] }
  0x78   :  { %v212_v51 = vmul.f32 0.6931472, %v496_v41  ;;  %507 = vlog2.f32 %v190_v48  ;;  %v295_v57 = vadd.f32 %v279_v49, %v247_v53  ;;  %v109_v26 = vmax.f32 %v774_v54, 0.0  ;;  %v270_v41 = vld [vmem:[#allocation9 + $0x68] sm:$0xff]  ;;  %v253_v47 = vld [vmem:[#allocation6 + $0x60] sm:$0xff]  ;;  %v272_v53 = vld [vmem:[#allocation9 + $0x78] sm:$0xff] }
  0x79   :  { %v498_v52 = vpop.eup %497  ;;  %v296_v16 = vadd.f32 %v280_v50, %v248_v55  ;;  %v281_v9 = vmul.f32 %v265_v32, %v233_v58  ;;  %v110_v1 = vmax.f32 %v776_v60, 0.0  ;;  %v111_v54 = vmax.f32 %v781_v13, 0.0  ;;  %v254_v48 = vld [vmem:[#allocation6 + $0x68] sm:$0xff] }
  0x7a   :  { %v234_v30 = vadd.f32 %v212_v51, %v106_v46  ;;  %v191_v62 = vadd.f32 1.0, %v498_v52  ;;  %v112_v60 = vmax.f32 %v785_v27, 0.0  ;;  %v271_v52 = vld [vmem:[#allocation9 + $0x70] sm:$0xff] }
  0x7b   :  { %v500_v56 = vpop.eup %499  ;;  %v308_v6 = vpack.c.bf16 %v296_v16, %v295_v57  ;;  %v297_v19 = vadd.f32 %v281_v9, %v249_v12  ;;  %v255_v27 = vld [vmem:[#allocation6 + $0x70] sm:$0xff] }
  0x7c   :  { %420 = vmatpush3.bf16.xpose.msra.mxu0 %v306_v28  ;;  %v192_v5 = vadd.f32 1.0, %v500_v56  ;;  %v282_v10 = vmul.f32 %v266_v61, %v234_v30  ;;  %509 = vlog2.f32 %v191_v62  ;;  %v448_v30 = vld [vmem:[#allocation3] sm:$0xff]  }
  0x7d   :  { %421 = vmatprep.subr.bf16.mxu0 %v639_v0  ;;  %v502_v15 = vpop.eup %501 }
  0x7e   :  { %v504_v59 = vpop.eup %503  ;;  %v214_v4 = vmul.f32 0.6931472, %v502_v15  ;;  %511 = vlog2.f32 %v192_v5  ;;  %v298_v20 = vadd.f32 %v282_v10, %v250_v14  ;;  %v256_v15 = vld [vmem:[#allocation6 + $0x78] sm:$0xff] }
  0x7f   :  { %v216_v11 = vmul.f32 0.6931472, %v504_v59  ;;  %v406_v59 = vld [vmem:[%s831_s4] ss:$0 sm:$0xff] }
  0x80   :  { %v235_v17 = vadd.f32 %v214_v4, %v107_v63  ;;  %v506_v18 = vpop.eup %505  ;;  %v309_v28 = vpack.c.bf16 %v298_v20, %v297_v19 }
  0x81   :  { %v236_v21 = vadd.f32 %v216_v11, %v108_v3  ;;  %v218_v31 = vmul.f32 0.6931472, %v506_v18 }
  0x82   :  { %v508_v38 = vpop.eup %507  ;;  %v283_v25 = vmul.f32 %v267_v23, %v235_v17 }
  0x83   :  { %v284_v29 = vmul.f32 %v268_v40, %v236_v21  ;;  %v220_v2 = vmul.f32 0.6931472, %v508_v38  ;;  %v237_v22 = vadd.f32 %v218_v31, %v109_v26 }
  0x84   :  { %422 = vmatpush3.bf16.xpose.msra.mxu0 %v307_v8  ;;  %v299_v36 = vadd.f32 %v283_v25, %v251_v33 }
  0x85   :  { %423 = vmatprep.subr.bf16.mxu0 %v639_v0  ;;  %v300_v7 = vadd.f32 %v284_v29, %v252_v34  ;;  %v238_v37 = vadd.f32 %v220_v2, %v110_v1  ;;  %v285_v44 = vmul.f32 %v269_v24, %v237_v22 }
  0x86   :  { %v510_v35 = vpop.eup %509 }
  0x87   :  { %v222_v42 = vmul.f32 0.6931472, %v510_v35  ;;  %v310_v43 = vpack.c.bf16 %v300_v7, %v299_v36  ;;  %v286_v45 = vmul.f32 %v270_v41, %v238_v37  ;;  %v301_v8 = vadd.f32 %v285_v44, %v253_v47 }
  0x88   :  { %v512_v39 = vpop.eup %511 }
  0x89   :  { %v224_v46 = vmul.f32 0.6931472, %v512_v39  ;;  %v302_v49 = vadd.f32 %v286_v45, %v254_v48  ;;  %v239_v50 = vadd.f32 %v222_v42, %v111_v54 }
  0x8b   :  { %v240_v51 = vadd.f32 %v224_v46, %v112_v60  ;;  %v311_v55 = vpack.c.bf16 %v302_v49, %v301_v8  ;;  %v287_v13 = vmul.f32 %v271_v52, %v239_v50 }
  0x8c   :  { %424 = vmatpush3.bf16.xpose.msra.mxu0 %v308_v6 }
  0x8d   :  { %425 = vmatprep.subr.bf16.mxu0 %v639_v0  ;;  %v288_v56 = vmul.f32 %v272_v53, %v240_v51  ;;  %v303_v57 = vadd.f32 %v287_v13, %v255_v27 }
  0x8f   :  { %v304_v16 = vadd.f32 %v288_v56, %v256_v15 }
  0x91   :  { %v312_v58 = vpack.c.bf16 %v304_v16, %v303_v57 }
  0x94   :  { %426 = vmatpush3.bf16.xpose.msra.mxu0 %v309_v28 }
  0x95   :  { %427 = vmatprep.subr.bf16.mxu0 %v639_v0 }
  0x9c   :  { %428 = vmatpush3.bf16.xpose.msra.mxu0 %v310_v43 }
  0x9d   :  { %429 = vmatprep.subr.bf16.mxu0 %v639_v0 }
  0xa4   :  { %430 = vmatpush3.bf16.xpose.msra.mxu0 %v311_v55 }
  0xa5   :  { %431 = vmatprep.subr.bf16.mxu0 %v639_v0 }
  0xac   :  { %432 = vmatpush3.bf16.xpose.msra.mxu0 %v312_v58 }
  0xb3   :  { %434 = vmatmul.mubr.bf16.vlgmr.msra.gmra.mrb[0].mxu0 %v448_v30 }
 0x186   :  { %v378_v32 = vpop.f32.mrb[0].mxu0 }
 0x187   :  { %v379_v61 = vadd.f32 %v406_v59, %v378_v32  ;;  %v435_v62 = vpop.f32.mrb[1].mxu0 }
 0x188   :  { %v381_v63 = vpop.f32.mrb[2].mxu0 }
 0x189   :  { %385 = vst [vmem:[#allocation11] sm:$0xff] %v379_v61  ;;  %v382_v3 = vadd.f32 %v406_v59, %v381_v63  ;;  %v436_v4 = vpop.f32.mrb[3].mxu0 }
 0x18b   :  { %386 = vst [vmem:[#allocation11 + $0x8] sm:$0xff] %v382_v3 }
 0x18c   :  { %612 = shalt.err (!%p609_p8)
}
 0x18d   :  { %s613_s23 = scalar_lea.hbm %s832_s5, 256 }
 0x18e   :  { %p614_p9 = scmp.ne.s32.totalorder %s832_s5, %s613_s23  ;;  %p617_p10 = scmp.lt.u32.totalorder %s613_s23, %s832_s5 }
 0x190   :  { %p619_p11 = pnand %p617_p10, %p614_p9 }
 0x192   :  { %622 = shalt.err (!%p619_p11)
}
 0x193   :  { %398 = dma.vmem_to_hbm [thread:$0]  %s393_s20, 256, %s832_s5, [#allocation5], %s632_s28, %s632_s28, %s633_s29  }
 0x194   :  { %629 = dma.done.wait [#allocation5], 256  }
 0x195   :  { %630 = vsyncadd [#allocation5], 4294967040 }
 0x196   :  { %402 = vsyncpa [#allocation4], 1 }
 0x197   :  { %403 = vsyncpa [#allocation7], 1 }
 0x198   :  { %404 = vsyncpa [#allocation10], 1 }
 0x199   :  { %405 = vsyncpa [#allocation5], 1 }

</bundles_post_ra>
